<compile_context>
chip_gen: v6e
topology: v6e:2x2x1
jax: 0.10.0
libtpu: 0.0.40
codegen_flags: <defaults>
</compile_context>

<pallas_src>
import jax
import jax.numpy as jnp
from jax.experimental import pallas as pl
from jax.experimental.pallas import tpu as pltpu

LANE = 128


def _round_up(x, m):
    return (x + m - 1) // m * m


def _mlp_kernel(x_ref,
                w1_ref, b1_ref,
                w2_ref, b2_ref,
                w3_ref, b3_ref,
                w4_ref, b4_ref,
                o_ref):
    bf16 = jnp.bfloat16
    # fc1 + ReLU   (x is f32 in VMEM; cast to bf16 here -> full-rate MXU)
    h = jnp.dot(x_ref[...].astype(bf16), w1_ref[...],
                preferred_element_type=jnp.float32)
    h = jnp.maximum(h + b1_ref[...], 0.0)
    # fc2 + ReLU
    h = jnp.dot(h.astype(bf16), w2_ref[...], preferred_element_type=jnp.float32)
    h = jnp.maximum(h + b2_ref[...], 0.0)
    # fc3 + ReLU
    h = jnp.dot(h.astype(bf16), w3_ref[...], preferred_element_type=jnp.float32)
    h = jnp.maximum(h + b3_ref[...], 0.0)
    # fc4 (logits) -- w4/b4 are zero-padded to a lane-dense 128-wide output
    h = jnp.dot(h.astype(bf16), w4_ref[...], preferred_element_type=jnp.float32)
    o_ref[...] = (h + b4_ref[...]).astype(o_ref.dtype)


def prepare_params(params):
    """One-time weight preprocessing (hoisted out of the forward path).

    Casts weights to bf16, keeps biases f32, zero-pads the last layer to a
    lane-dense 128-wide output slab.
    """
    num_classes = params["w4"].shape[1]
    n_pad = _round_up(max(num_classes, LANE), LANE)
    bf16 = jnp.bfloat16
    prepped = {
        "w1": params["w1"].astype(bf16),
        "b1": params["b1"].astype(jnp.float32),
        "w2": params["w2"].astype(bf16),
        "b2": params["b2"].astype(jnp.float32),
        "w3": params["w3"].astype(bf16),
        "b3": params["b3"].astype(jnp.float32),
        "w4": jnp.pad(params["w4"],
                      ((0, 0), (0, n_pad - num_classes))).astype(bf16),
        "b4": jnp.pad(params["b4"],
                      ((0, 0), (0, n_pad - num_classes))).astype(jnp.float32),
    }
    return prepped


def tuned_sensor_classifier(x, prepped, *, num_classes, block_b=1024,
                            gridless_max_b=2048, out_dtype=jnp.bfloat16):
    """x: (B, input_size) float32. prepped: output of prepare_params()."""
    B, input_size = x.shape
    n_pad = prepped["w4"].shape[1]
    weight_args = (prepped["w1"], prepped["b1"], prepped["w2"], prepped["b2"],
                   prepped["w3"], prepped["b3"], prepped["w4"], prepped["b4"])

    w_bytes = sum(int(a.size) * a.dtype.itemsize for a in weight_args)
    cost = pl.CostEstimate(
        flops=2 * B * (input_size * 256 + 256 * 128 + 128 * 64 + 64 * n_pad),
        transcendentals=0,
        bytes_accessed=(B * input_size * 4 + w_bytes
                        + B * n_pad * jnp.dtype(out_dtype).itemsize),
    )

    if B <= gridless_max_b:
        # Small/medium problem: everything fits in VMEM, skip pipeline machinery.
        in_specs = [pl.BlockSpec(memory_space=pltpu.MemorySpace.VMEM)
                    for _ in range(1 + len(weight_args))]
        out = pl.pallas_call(
            _mlp_kernel,
            out_shape=jax.ShapeDtypeStruct((B, n_pad), out_dtype),
            in_specs=in_specs,
            out_specs=pl.BlockSpec(memory_space=pltpu.MemorySpace.VMEM),
            cost_estimate=cost,
        )(x, *weight_args)
        return out[:, :num_classes]

    # Batch-tiled path: grid over batch tiles, weights/biases VMEM-resident.
    num_tiles = pl.cdiv(B, block_b)
    if num_tiles > 1 and num_tiles % 2 == 1:
        # v7x: keep the parallel grid-step count even so both TCs stay busy.
        num_tiles += 1
        block_b = max(8, _round_up(pl.cdiv(B, num_tiles), 8))
        num_tiles = pl.cdiv(B, block_b)

    def _resident_spec(shape):
        # Same block every step -> DMA'd once, stays resident in VMEM.
        return pl.BlockSpec(shape, lambda i: (0, 0))

    in_specs = [pl.BlockSpec((block_b, input_size), lambda i: (i, 0))]
    in_specs += [_resident_spec(tuple(a.shape)) for a in weight_args]
    out_spec = pl.BlockSpec((block_b, n_pad), lambda i: (i, 0))

    out = pl.pallas_call(
        _mlp_kernel,
        out_shape=jax.ShapeDtypeStruct((B, n_pad), out_dtype),
        grid_spec=pl.GridSpec(grid=(num_tiles,),
                              in_specs=in_specs, out_specs=out_spec),
        compiler_params=pltpu.CompilerParams(
            dimension_semantics=("parallel",),       # v7x: 2 TCs split the tiles
            vmem_limit_bytes=32 * 1024 * 1024,       # safe on v5e/v6e/v7x
        ),
        cost_estimate=cost,
    )(x, *weight_args)
    # Ragged last tile: rows >= B were never written to HBM (OOB writes dropped),
    # and out_shape is exactly (B, n_pad), so only the lane slice remains.
    return out[:, :num_classes]


def init_params(key, input_size, num_classes):
    """Deterministic synthetic init (PyTorch Linear shapes, stored transposed)."""
    dims = [(input_size, 256), (256, 128), (128, 64), (64, num_classes)]
    params = {}
    for i, (din, dout) in enumerate(dims, start=1):
        key, kw, kb = jax.random.split(key, 3)
        bound = 1.0 / jnp.sqrt(jnp.float32(din))
        params[f"w{i}"] = jax.random.uniform(
            kw, (din, dout), jnp.float32, minval=-bound, maxval=bound)
        params[f"b{i}"] = jax.random.uniform(
            kb, (1, dout), jnp.float32, minval=-bound, maxval=bound)
    return params


def reference_forward(x, params):
    """Pure-JAX reference mirroring the kernel's bf16-matmul / f32-accumulate math."""
    bf16 = jnp.bfloat16
    h = jnp.dot(x.astype(bf16), params["w1"].astype(bf16),
                preferred_element_type=jnp.float32) + params["b1"]
    h = jnp.maximum(h, 0.0)
    h = jnp.dot(h.astype(bf16), params["w2"].astype(bf16),
                preferred_element_type=jnp.float32) + params["b2"]
    h = jnp.maximum(h, 0.0)
    h = jnp.dot(h.astype(bf16), params["w3"].astype(bf16),
                preferred_element_type=jnp.float32) + params["b3"]
    h = jnp.maximum(h, 0.0)
    h = jnp.dot(h.astype(bf16), params["w4"].astype(bf16),
                preferred_element_type=jnp.float32) + params["b4"]
    return h


if __name__ == "__main__":
    key = jax.random.PRNGKey(0)
    input_size, num_classes = 32, 10
    k_p, k_x1, k_x2, k_x3 = jax.random.split(key, 4)
    params = init_params(k_p, input_size, num_classes)
    prepped = prepare_params(params)           # one-time, hoisted out of forward

    fwd = jax.jit(tuned_sensor_classifier,
                  static_argnames=("num_classes", "block_b",
                                   "gridless_max_b", "out_dtype"))

    # 1) tiny batch -> gridless VMEM-resident path, bf16 logits
    B_small = 8
    x_small = jax.random.normal(k_x1, (B_small, input_size), jnp.float32)
    out_small = jax.block_until_ready(fwd(x_small, prepped, num_classes=num_classes))
    ref_small = reference_forward(x_small, params)
    assert out_small.shape == (B_small, num_classes)
    assert out_small.dtype == jnp.bfloat16
    assert jnp.allclose(out_small.astype(jnp.float32), ref_small,
                        atol=3e-2, rtol=3e-2), "small-batch mismatch"

    # 2) medium batch -> still gridless (raised threshold), f32 logits variant
    B_mid = 1024
    x_mid = jax.random.normal(k_x2, (B_mid, input_size), jnp.float32)
    out_mid = jax.block_until_ready(
        fwd(x_mid, prepped, num_classes=num_classes, out_dtype=jnp.float32))
    ref_mid = reference_forward(x_mid, params)
    assert out_mid.shape == (B_mid, num_classes)
    assert jnp.allclose(out_mid, ref_mid, atol=1e-2, rtol=1e-2), "mid-batch mismatch"

    # 3) ragged batch, forced onto the tiled path (even grid steps, no x pad)
    B_big = 1000
    x_big = jax.random.normal(k_x3, (B_big, input_size), jnp.float32)
    out_big = jax.block_until_ready(
        fwd(x_big, prepped, num_classes=num_classes,
            block_b=256, gridless_max_b=256))
    ref_big = reference_forward(x_big, params)
    assert out_big.shape == (B_big, num_classes)
    assert jnp.allclose(out_big.astype(jnp.float32), ref_big,
                        atol=3e-2, rtol=3e-2), "tiled-batch mismatch"

    print("KERNEL_OK")
</pallas_src>

<mosaic_0001>
module attributes {stable_mosaic.version = 11 : i64} {
  func.func @_mlp_kernel(%arg0: memref<8x32xf32, #tpu.memory_space<vmem>>, %arg1: memref<32x256xbf16, #tpu.memory_space<vmem>>, %arg2: memref<1x256xf32, #tpu.memory_space<vmem>>, %arg3: memref<256x128xbf16, #tpu.memory_space<vmem>>, %arg4: memref<1x128xf32, #tpu.memory_space<vmem>>, %arg5: memref<128x64xbf16, #tpu.memory_space<vmem>>, %arg6: memref<1x64xf32, #tpu.memory_space<vmem>>, %arg7: memref<64x128xbf16, #tpu.memory_space<vmem>>, %arg8: memref<1x128xf32, #tpu.memory_space<vmem>>, %arg9: memref<8x128xbf16, #tpu.memory_space<vmem>>) attributes {dimension_semantics = [], scalar_prefetch = 0 : i64, scratch_operands = 0 : i64, tpu.core_type = #tpu.core_type<tc>} {
    %c0 = arith.constant 0 : index
    %c0_0 = arith.constant 0 : index
    %0 = vector.load %arg0[%c0, %c0_0] : memref<8x32xf32, #tpu.memory_space<vmem>>, vector<8x32xf32>
    %1 = arith.truncf %0 : vector<8x32xf32> to vector<8x32xbf16>
    %c0_1 = arith.constant 0 : index
    %c0_2 = arith.constant 0 : index
    %2 = vector.load %arg1[%c0_1, %c0_2] : memref<32x256xbf16, #tpu.memory_space<vmem>>, vector<32x256xbf16>
    %cst = arith.constant dense<0.000000e+00> : vector<8x256xf32>
    %3 = tpu.matmul %1, %2, %cst {dimension_numbers = #tpu.dot_dimension_numbers<[1], [0], [0], [1], [0, 0, 1, 1], [], []>} : vector<8x32xbf16>, vector<32x256xbf16>, vector<8x256xf32> -> vector<8x256xf32>
    %c0_3 = arith.constant 0 : index
    %c0_4 = arith.constant 0 : index
    %4 = vector.load %arg2[%c0_3, %c0_4] : memref<1x256xf32, #tpu.memory_space<vmem>>, vector<1x256xf32>
    %5 = vector.broadcast %4 : vector<1x256xf32> to vector<8x256xf32>
    %6 = arith.addf %3, %5 : vector<8x256xf32>
    %cst_5 = arith.constant 0.000000e+00 : f32
    %7 = vector.broadcast %cst_5 : f32 to vector<8x256xf32>
    %8 = arith.maximumf %6, %7 : vector<8x256xf32>
    %9 = arith.truncf %8 : vector<8x256xf32> to vector<8x256xbf16>
    %c0_6 = arith.constant 0 : index
    %c0_7 = arith.constant 0 : index
    %10 = vector.load %arg3[%c0_6, %c0_7] : memref<256x128xbf16, #tpu.memory_space<vmem>>, vector<256x128xbf16>
    %cst_8 = arith.constant dense<0.000000e+00> : vector<8x128xf32>
    %11 = tpu.matmul %9, %10, %cst_8 {dimension_numbers = #tpu.dot_dimension_numbers<[1], [0], [0], [1], [0, 0, 1, 1], [], []>} : vector<8x256xbf16>, vector<256x128xbf16>, vector<8x128xf32> -> vector<8x128xf32>
    %c0_9 = arith.constant 0 : index
    %c0_10 = arith.constant 0 : index
    %12 = vector.load %arg4[%c0_9, %c0_10] : memref<1x128xf32, #tpu.memory_space<vmem>>, vector<1x128xf32>
    %13 = vector.broadcast %12 : vector<1x128xf32> to vector<8x128xf32>
    %14 = arith.addf %11, %13 : vector<8x128xf32>
    %cst_11 = arith.constant 0.000000e+00 : f32
    %15 = vector.broadcast %cst_11 : f32 to vector<8x128xf32>
    %16 = arith.maximumf %14, %15 : vector<8x128xf32>
    %17 = arith.truncf %16 : vector<8x128xf32> to vector<8x128xbf16>
    %c0_12 = arith.constant 0 : index
    %c0_13 = arith.constant 0 : index
    %18 = vector.load %arg5[%c0_12, %c0_13] : memref<128x64xbf16, #tpu.memory_space<vmem>>, vector<128x64xbf16>
    %cst_14 = arith.constant dense<0.000000e+00> : vector<8x64xf32>
    %19 = tpu.matmul %17, %18, %cst_14 {dimension_numbers = #tpu.dot_dimension_numbers<[1], [0], [0], [1], [0, 0, 1, 1], [], []>} : vector<8x128xbf16>, vector<128x64xbf16>, vector<8x64xf32> -> vector<8x64xf32>
    %c0_15 = arith.constant 0 : index
    %c0_16 = arith.constant 0 : index
    %20 = vector.load %arg6[%c0_15, %c0_16] : memref<1x64xf32, #tpu.memory_space<vmem>>, vector<1x64xf32>
    %21 = vector.broadcast %20 : vector<1x64xf32> to vector<8x64xf32>
    %22 = arith.addf %19, %21 : vector<8x64xf32>
    %cst_17 = arith.constant 0.000000e+00 : f32
    %23 = vector.broadcast %cst_17 : f32 to vector<8x64xf32>
    %24 = arith.maximumf %22, %23 : vector<8x64xf32>
    %25 = arith.truncf %24 : vector<8x64xf32> to vector<8x64xbf16>
    %c0_18 = arith.constant 0 : index
    %c0_19 = arith.constant 0 : index
    %26 = vector.load %arg7[%c0_18, %c0_19] : memref<64x128xbf16, #tpu.memory_space<vmem>>, vector<64x128xbf16>
    %cst_20 = arith.constant dense<0.000000e+00> : vector<8x128xf32>
    %27 = tpu.matmul %25, %26, %cst_20 {dimension_numbers = #tpu.dot_dimension_numbers<[1], [0], [0], [1], [0, 0, 1, 1], [], []>} : vector<8x64xbf16>, vector<64x128xbf16>, vector<8x128xf32> -> vector<8x128xf32>
    %c0_21 = arith.constant 0 : index
    %c0_22 = arith.constant 0 : index
    %28 = vector.load %arg8[%c0_21, %c0_22] : memref<1x128xf32, #tpu.memory_space<vmem>>, vector<1x128xf32>
    %29 = vector.broadcast %28 : vector<1x128xf32> to vector<8x128xf32>
    %30 = arith.addf %27, %29 : vector<8x128xf32>
    %31 = arith.truncf %30 : vector<8x128xf32> to vector<8x128xbf16>
    %c0_23 = arith.constant 0 : index
    %c0_24 = arith.constant 0 : index
    %32 = vector.load %arg9[%c0_23, %c0_24] : memref<8x128xbf16, #tpu.memory_space<vmem>>, vector<8x128xbf16>
    tpu.vector_store %arg9[%c0_23, %c0_24], %31 {strides = array<i32>} : memref<8x128xbf16, #tpu.memory_space<vmem>>, vector<8x128xbf16>,
    return
  }
}

</mosaic_0001>

<bundles_post_ra>
// kernel: tuned_sensor_classifier.1
= control target key start
LH: loop header
LB: loop body
LE: loop exit
PB: predicated region body
PF: predicated region fallthrough
CT: control target
= control target key end

     0   :  { %14 = vsyncpa [#allocation3], 0  ;;  %s855_s0 = inlined_call_operand.vmem [shape: f32[8,32], index: 0, kind: input, shape index: {}]   ;;  %s856_s1 = inlined_call_operand.vmem [shape: bf16[32,256], index: 1, kind: input, shape index: {}]   ;;  %s857_s2 = inlined_call_operand.vmem [shape: f32[1,256], index: 2, kind: input, shape index: {}]   ;;  %s858_s3 = inlined_call_operand.hbm [shape: bf16[256,128], index: 3, kind: input, shape index: {}]   ;;  %s859_s4 = inlined_call_operand.vmem [shape: f32[1,128], index: 4, kind: input, shape index: {}]   ;;  %s860_s5 = inlined_call_operand.vmem [shape: bf16[128,64], index: 5, kind: input, shape index: {}]   ;;  %s861_s6 = inlined_call_operand.vmem [shape: f32[1,64], index: 6, kind: input, shape index: {}]   ;;  %s862_s7 = inlined_call_operand.vmem [shape: bf16[64,128], index: 7, kind: input, shape index: {}]   ;;  %s863_s8 = inlined_call_operand.vmem [shape: f32[1,128], index: 8, kind: input, shape index: {}]   ;;  %s864_s9 = inlined_call_operand.hbm [shape: bf16[8,128], index: 9, kind: output, shape index: {}]  }
   0x1   :  { %15 = vsyncpa [#allocation4], 0  ;;  %s715_s30 = smov [#allocation2]  }
   0x2   :  { %s27_s10 = sshll.u32 %s715_s30, 4  ;;  %s28_s10 = int_to_ptr.vmem [resolvable:$true] %s27_s10 }
   0x3   :  { %s679_s11 = scalar_lea.vmem %s28_s10, 2048  ;;  %p684_p1 = scmp.lt.s32.totalorder %s28_s10, %s28_s10 }
   0x4   :  { %p680_p0 = scmp.ne.s32.totalorder %s28_s10, %s679_s11  ;;  %p685_p2 = scmp.lt.s32.totalorder %s679_s11, %s679_s11 }
   0x6   :  { %p686_p3 = por %p685_p2, %p684_p1 }
   0x8   :  { %p687_p4 = pnand %p686_p3, %p680_p0 }
   0xa   :  { %690 = shalt.err (!%p687_p4)
}
   0xb   :  { %s716_s12 = smov 64   ;;  %s717_s13 = smov 4  }
   0xc   :  { %33 = dma.hbm_to_vmem [thread:$0]  %s858_s3, 2048, %s28_s10, [#allocation3], %s716_s12, %s716_s12, %s717_s13  }
   0xd   :  { %711 = dma.done.wait [#allocation3], 2048  }
   0xe   :  { %712 = vsyncadd [#allocation3], 4294965248  ;;  %v718_v0 = vmov 0   ;;  %v637_v1 = vld [vmem:[%s856_s1 + $0x14] ss:$8 sps:$4 sm:$0xff]   ;;  %v48_v5 = vld [vmem:[%s855_s0] sm:$0xff]  ;;  %v56_v29 = vlaneseq }
   0xf   :  { %122 = vmatprep.mubr.bf16.mxu0 %v718_v0  ;;  %v639_v2 = vld [vmem:[%s856_s1 + $0x10] ss:$8 sps:$4 sm:$0xff]   ;;  %102 = vmatprep.subr.bf16.mxu0 %v637_v1  ;;  %v640_v3 = vld [vmem:[%s856_s1 + $0x4] ss:$8 sps:$4 sm:$0xff]   ;;  %v642_v4 = vld [vmem:[%s856_s1] ss:$8 sps:$4 sm:$0xff]   ;;  %v49_v9 = vpack.c.bf16 %v48_v5, %v48_v5 }
  0x10   :  { %103 = vmatpush1.bf16.msra.mxu0 %v639_v2  ;;  %v643_v6 = vld [vmem:[#allocation2 + $0x78] sm:$0xff]   ;;  %v645_v8 = vld [vmem:[#allocation2 + $0x70] sm:$0xff]   ;;  %vm86_vm0 = vcmask 261120   ;;  %v647_v11 = vld [vmem:[#allocation2 + $0x68] sm:$0xff]   ;;  %v719_v24 = vmov 0.0   ;;  %v57_v30 = vshrl.u32 %v56_v29, 7 }
  0x11   :  { %104 = vmatprep.subr.bf16.mxu0 %v640_v3  ;;  %v644_v7 = vld [vmem:[#allocation2 + $0x38] sm:$0xff]   ;;  %562 = vmatprep.subr.bf16.mxu1 %v643_v6  ;;  %v646_v10 = vld [vmem:[#allocation2 + $0x30] sm:$0xff]   ;;  %v648_v12 = vld [vmem:[#allocation2 + $0x28] sm:$0xff]   ;;  %vm720_vm1 = vmmov 0   ;;  %vm464_vm2 = vcmask 523264  }
  0x12   :  { %563 = vmatpush3.bf16.msra.mxu1 %v644_v7  ;;  %v649_v13 = vld [vmem:[#allocation2 + $0x60] sm:$0xff]   ;;  %v651_v15 = vld [vmem:[#allocation2 + $0x58] sm:$0xff]   ;;  %v653_v17 = vld [vmem:[#allocation2 + $0x50] sm:$0xff]   ;;  %v58_v31 = vsub.s32 0, %v57_v30  ;;  %v62_v33 = vsub.s32 1, %v57_v30 }
  0x13   :  { %564 = vmatprep.subr.bf16.mxu1 %v645_v8  ;;  %v650_v14 = vld [vmem:[#allocation2 + $0x20] sm:$0xff]   ;;  %v652_v16 = vld [vmem:[#allocation2 + $0x18] sm:$0xff]   ;;  %v654_v18 = vld [vmem:[#allocation2 + $0x10] sm:$0xff]  }
  0x14   :  { %105 = vmatpush1.bf16.msra.mxu0 %v642_v4  ;;  %v655_v19 = vld [vmem:[#allocation2 + $0x48] sm:$0xff]   ;;  %v657_v21 = vld [vmem:[#allocation2 + $0x40] sm:$0xff]   ;;  %v659_v23 = vld [vmem:[%s860_s5 + $0x38] sm:$0xff]  }
  0x15   :  { %v656_v20 = vld [vmem:[#allocation2 + $0x8] sm:$0xff]   ;;  %v658_v22 = vld [vmem:[#allocation2] sm:$0xff]   ;;  %598 = vmatprep.subr.bf16.mxu0 %v719_v24  ;;  %v660_v25 = vld [vmem:[%s860_s5 + $0x30] sm:$0xff]  }
  0x16   :  { %565 = vmatpush3.bf16.msra.mxu1 %v646_v10  ;;  %v661_v26 = vld [vmem:[%s860_s5 + $0x28] sm:$0xff]   ;;  %v662_v27 = vld [vmem:[%s860_s5 + $0x20] sm:$0xff]   ;;  %v663_v28 = vld [vmem:[%s860_s5 + $0x18] sm:$0xff]  }
  0x17   :  { %529 = vmatmul.mubr.msk.bf16.vlgmr.msra.gmra.mxu0 %vm86_vm0, %v49_v9  ;;  %566 = vmatprep.subr.bf16.mxu1 %v647_v11  ;;  %v54_v32 = vld [vmem:[%s857_s2] sm:$0x3]  ;;  %v664_v46 = vld [vmem:[%s860_s5 + $0x10] sm:$0xff]   ;;  %v665_v47 = vld [vmem:[%s860_s5 + $0x8] sm:$0xff]  }
  0x18   :  { %599 = vmatpush3.bf16.msra.mxu0 %v659_v23  ;;  %v59_v34 = vrot.slane %v54_v32, %v58_v31  ;;  %v63_v35 = vrot.slane %v54_v32, %v62_v33  ;;  %v666_v48 = vld [vmem:[%s860_s5] sm:$0xff]   ;;  %614 = vmatprep.mubr.msk.bf16.mxu0 %vm720_vm1, %v719_v24  ;;  %v667_v49 = vld [vmem:[%s862_s7 + $0x18] sm:$0xff]   ;;  %v668_v50 = vld [vmem:[%s862_s7 + $0x10] sm:$0xff]  }
  0x19   :  { %600 = vmatprep.subr.bf16.mxu0 %v719_v24  ;;  %v530_v52 = vld [vmem:[%s859_s4] ss:$0 sm:$0xff]  ;;  %v669_v60 = vld [vmem:[%s862_s7 + $0x8] sm:$0xff]  }
  0x1a   :  { %567 = vmatpush3.bf16.msra.mxu1 %v648_v12  ;;  %v670_v61 = vld [vmem:[%s862_s7] sm:$0xff]   ;;  %s721_s7 = smov [#allocation5]  }
  0x1b   :  { %568 = vmatprep.subr.bf16.mxu1 %v649_v13  ;;  %v547_v62 = vld [vmem:[%s861_s6] ss:$0 sm:$0xff]  ;;  %s516_s28 = sshll.u32 %s721_s7, 4  ;;  %s517_s28 = int_to_ptr.vmem [resolvable:$true] %s516_s28 }
  0x1c   :  { %601 = vmatpush3.bf16.msra.mxu0 %v660_v25  ;;  %v556_v6 = vld [vmem:[%s863_s8] ss:$0 sm:$0xff]  ;;  %s691_s6 = scalar_lea.vmem %s517_s28, 64  ;;  %p696_p6 = scmp.lt.s32.totalorder %s517_s28, %s517_s28 }
  0x1d   :  { %602 = vmatprep.subr.bf16.mxu0 %v719_v24  ;;  %p692_p5 = scmp.ne.s32.totalorder %s517_s28, %s691_s6  ;;  %p697_p7 = scmp.lt.s32.totalorder %s691_s6, %s691_s6 }
  0x1e   :  { %569 = vmatpush3.bf16.msra.mxu1 %v650_v14 }
  0x1f   :  { %570 = vmatprep.subr.bf16.mxu1 %v651_v15  ;;  %p698_p8 = por %p697_p7, %p696_p6 }
  0x20   :  { %603 = vmatpush3.bf16.msra.mxu0 %v661_v26 }
  0x21   :  { %604 = vmatprep.subr.bf16.mxu0 %v719_v24  ;;  %p699_p9 = pnand %p698_p8, %p692_p5 }
  0x22   :  { %571 = vmatpush3.bf16.msra.mxu1 %v652_v16 }
  0x23   :  { %572 = vmatprep.subr.bf16.mxu1 %v653_v17 }
  0x24   :  { %605 = vmatpush3.bf16.msra.mxu0 %v662_v27 }
  0x25   :  { %606 = vmatprep.subr.bf16.mxu0 %v719_v24 }
  0x26   :  { %573 = vmatpush3.bf16.msra.mxu1 %v654_v18 }
  0x27   :  { %574 = vmatprep.subr.bf16.mxu1 %v655_v19 }
  0x28   :  { %607 = vmatpush3.bf16.msra.mxu0 %v663_v28 }
  0x29   :  { %608 = vmatprep.subr.bf16.mxu0 %v719_v24 }
  0x2a   :  { %575 = vmatpush3.bf16.msra.mxu1 %v656_v20 }
  0x2b   :  { %576 = vmatprep.subr.bf16.mxu1 %v657_v21 }
  0x2c   :  { %609 = vmatpush3.bf16.msra.mxu0 %v664_v46 }
  0x2d   :  { %610 = vmatprep.subr.bf16.mxu0 %v719_v24 }
  0x2e   :  { %577 = vmatpush3.bf16.msra.mxu1 %v658_v22 }
  0x2f   :  { %618 = vmatprep.subr.bf16.mxu1 %v719_v24 }
  0x30   :  { %611 = vmatpush3.bf16.msra.mxu0 %v665_v47 }
  0x31   :  { %612 = vmatprep.subr.bf16.mxu0 %v719_v24 }
  0x34   :  { %613 = vmatpush3.bf16.msra.mxu0 %v666_v48 }
  0xd7   :  { %v124_v36 = vpop.f32.mrf.mxu0 }
  0xd8   :  { %v125_v37 = vadd.f32 %v124_v36, %v59_v34 }
  0xd9   :  { %v126_v38 = vpop.f32.mrf.mxu0 }
  0xda   :  { %v127_v39 = vadd.f32 %v126_v38, %v63_v35  ;;  %v131_v40 = vmax.f32 %v125_v37, 0.0 }
  0xdb   :  { %v128_v41 = vpop.f32.mrf.mxu0 }
  0xdc   :  { %v132_v42 = vmax.f32 %v127_v39, 0.0  ;;  %v133_v45 = vpack.c.bf16 %v131_v40, %v131_v40 }
  0xdd   :  { %v129_v43 = vpop.f32.mrf.mxu0 }
  0xde   :  { %v134_v44 = vpack.c.bf16 %v132_v42, %v132_v42 }
  0xe0   :  { %302 = vmatprep.mubr.bf16.mxu1 %v134_v44 }
  0xe1   :  { %303 = vmatmul.mubr.bf16.vlgmr.msra.gmra.mxu1 %v133_v45 }
  0xe2   :  { %626 = vmatprep.mubr.msk.bf16.mxu1 %vm720_vm1, %v719_v24  ;;  %619 = vmatpush3.bf16.msra.mxu1 %v667_v49 }
  0xe3   :  { %620 = vmatprep.subr.bf16.mxu1 %v719_v24 }
  0xe6   :  { %621 = vmatpush3.bf16.msra.mxu1 %v668_v50 }
  0xe7   :  { %622 = vmatprep.subr.bf16.mxu1 %v719_v24 }
  0xea   :  { %623 = vmatpush3.bf16.msra.mxu1 %v669_v60 }
  0xeb   :  { %624 = vmatprep.subr.bf16.mxu1 %v719_v24 }
  0xee   :  { %625 = vmatpush3.bf16.msra.mxu1 %v670_v61 }
 0x1a1   :  { %v578_v51 = vpop.f32.mrf.mxu1 }
 0x1a3   :  { %v579_v53 = vpop.f32.mrf.mxu1 }
 0x1a4   :  { %v580_v54 = vadd.f32 %v579_v53, %v578_v51 }
 0x1a5   :  { %v581_v55 = vpop.f32.mrf.mxu1 }
 0x1a6   :  { %v305_v56 = vadd.f32 %v580_v54, %v530_v52 }
 0x1a7   :  { %v582_v57 = vpop.f32.mrf.mxu1 }
 0x1a8   :  { %v310_v58 = vmax.f32 %v305_v56, 0.0 }
 0x1aa   :  { %v311_v59 = vpack.c.bf16 %v310_v58, %v310_v58 }
 0x1ac   :  { %615 = vmatmul.mubr.bf16.vlgmr.msra.gmra.mxu0 %v311_v59 }
 0x26c   :  { %v417_v63 = vpop.f32.mrf.mxu0 }
 0x26d   :  { %v418_v0 = vadd.f32 %v547_v62, %v417_v63 }
 0x26e   :  { %v616_v1 = vpop.f32.mrf.mxu0 }
 0x26f   :  { %v423_v2 = vmax.f32 %v418_v0, 0.0 }
 0x270   :  { %v420_v3 = vpop.f32.mrf.mxu0 }
 0x271   :  { %v424_v4 = vpack.c.bf16 %v423_v2, %v423_v2 }
 0x272   :  { %v617_v5 = vpop.f32.mrf.mxu0 }
 0x273   :  { %627 = vmatmul.mubr.msk.bf16.vlgmr.msra.gmra.mxu1 %vm464_vm2, %v424_v4 }
 0x333   :  { %v502_v7 = vpop.f32.mrf.mxu1 }
 0x334   :  { %v503_v8 = vadd.f32 %v556_v6, %v502_v7 }
 0x335   :  { %v628_v9 = vpop.f32.mrf.mxu1 }
 0x336   :  { %v508_v10 = vpack.c.bf16 %v503_v8, %v503_v8 }
 0x337   :  { %v505_v11 = vpop.f32.mrf.mxu1 }
 0x338   :  { %509 = vst [vmem:[#allocation5] sm:$0xf] %v508_v10 }
 0x339   :  { %v629_v12 = vpop.f32.mrf.mxu1 }
 0x33a   :  { %702 = shalt.err (!%p699_p9)
}
 0x33b   :  { %519 = dma.vmem_to_hbm [thread:$0]  %s517_s28, 64, %s864_s9, [#allocation4]  }
 0x33c   :  { %713 = dma.done.wait [#allocation4], 64  }
 0x33d   :  { %714 = vsyncadd [#allocation4], 4294967232 }
 0x33e   :  { %523 = vsyncpa [#allocation3], 1 }
 0x33f   :  { %524 = vsyncpa [#allocation4], 1 }

</bundles_post_ra>
